<compile_context>
chip_gen: v7x
topology: tpu7x:2x2x1
jax: 0.10.0
libtpu: 0.0.40
codegen_flags: <defaults>
</compile_context>

<pallas_src>
import jax
import jax.numpy as jnp
from jax.experimental import pallas as pl
from jax.experimental.pallas import tpu as pltpu


def _round_up(n, m):
    return ((n + m - 1) // m) * m


def _input_wrapper_mlp_kernel(t_ref, x_ref, w1t_ref, w1x_ref, b1_ref,
                              w2_ref, b2_ref, w3_ref, b3_ref, o_ref):
    """Fused: time-concat + 3-layer MLP (tanh activations) on one batch tile."""
    t = t_ref[0, 0]                      # scalar time from SMEM
    x = x_ref[...]                       # (TB, D), compute dtype

    # Layer 1:  tx @ W1 + b1  ==  x @ W1[1:] + (t * W1[0] + b1)
    # Fold the time row into the bias once per tile (one (1,H) VPU op), then a
    # single broadcast-add over the (TB,H) matmul result.
    tb1 = t * w1t_ref[...] + b1_ref[...]                         # (1, H), f32
    h = jnp.dot(x, w1x_ref[...], preferred_element_type=jnp.float32) + tb1
    h = jnp.tanh(h)

    # Layer 2
    h = jnp.tanh(jnp.dot(h.astype(w2_ref.dtype), w2_ref[...],
                         preferred_element_type=jnp.float32) + b2_ref[...])

    # Layer 3 (no activation — velocity output)
    out = jnp.dot(h.astype(w3_ref.dtype), w3_ref[...],
                  preferred_element_type=jnp.float32) + b3_ref[...]
    o_ref[...] = out.astype(o_ref.dtype)


def input_wrapper_forward(x, t, params, *, block_rows=256,
                          compute_dtype=jnp.float32):
    """x: [B, D] f32, t: scalar f32 -> [B, D] f32 (velocity).

    block_rows:    target batch-tile height (>=128 recommended for MXU/sublane
                   utilisation; clamped to the batch size for tiny inputs).
    compute_dtype: jnp.float32 (default) or jnp.bfloat16 for the matmul
                   operands on v6e/v7x (accumulation stays f32).
    """
    B, D = x.shape
    w1, b1, w2, b2, w3, b3 = params
    H = w1.shape[1]
    out_dim = w3.shape[1]

    # ---- batch tiling (pad B up to a multiple of the tile height) ----------
    TB = min(int(block_rows), _round_up(B, 8))        # multiple of 8 sublanes
    B_pad = _round_up(B, TB)
    if B_pad != B:
        x = jnp.pad(x, ((0, B_pad - B), (0, 0)))
    n_tiles = B_pad // TB

    # ---- glue: split first-layer weight, 2-D biases, compute-dtype casts ---
    w1t = w1[0:1, :].astype(jnp.float32)               # (1, H) time row (VPU)
    w1x = w1[1:, :].astype(compute_dtype)              # (D, H)
    x_in = x.astype(compute_dtype)
    w2c = w2.astype(compute_dtype)
    w3c = w3.astype(compute_dtype)
    b1r = b1.reshape(1, H).astype(jnp.float32)
    b2r = b2.reshape(1, H).astype(jnp.float32)
    b3r = b3.reshape(1, out_dim).astype(jnp.float32)
    t_arr = jnp.reshape(jnp.asarray(t, dtype=jnp.float32), (1, 1))

    # ---- cost estimate (scheduling hint for XLA around the custom call) ----
    itemsize = jnp.dtype(compute_dtype).itemsize
    flops = 2 * B_pad * (D * H + H * H + H * out_dim)
    bytes_accessed = (B_pad * D * itemsize                    # x in
                      + B_pad * out_dim * 4                   # out
                      + (D * H + H * H + H * out_dim) * itemsize  # weights
                      + (3 * H + 2 * out_dim) * 4)            # biases + w1t
    cost = pl.CostEstimate(flops=flops,
                           transcendentals=2 * B_pad * H,     # two tanh layers
                           bytes_accessed=bytes_accessed)

    const = lambda i: (0, 0)   # weights/biases: same block every grid step
                               # -> stay VMEM-resident, no per-tile re-DMA.

    out = pl.pallas_call(
        _input_wrapper_mlp_kernel,
        out_shape=jax.ShapeDtypeStruct((B_pad, out_dim), jnp.float32),
        grid=(n_tiles,),
        in_specs=[
            pl.BlockSpec(memory_space=pltpu.MemorySpace.SMEM),  # t   (1,1)
            pl.BlockSpec((TB, D), lambda i: (i, 0)),            # x tile
            pl.BlockSpec((1, H), const),                        # w1t
            pl.BlockSpec((D, H), const),                        # w1x
            pl.BlockSpec((1, H), const),                        # b1
            pl.BlockSpec((H, H), const),                        # w2
            pl.BlockSpec((1, H), const),                        # b2
            pl.BlockSpec((H, out_dim), const),                  # w3
            pl.BlockSpec((1, out_dim), const),                  # b3
        ],
        out_specs=pl.BlockSpec((TB, out_dim), lambda i: (i, 0)),
        compiler_params=pltpu.CompilerParams(
            dimension_semantics=("parallel",)),                 # v7x: 2 TCs
        cost_estimate=cost,
    )(t_arr, x_in, w1t, w1x, b1r, w2c, b2r, w3c, b3r)

    return out[:B]


def init_params(key, ndim, hidden):
    """Deterministic synthetic init for v = MLP(ndim+1 -> hidden -> hidden -> ndim)."""
    k1, k2, k3 = jax.random.split(key, 3)
    s1 = 1.0 / jnp.sqrt(ndim + 1.0)
    s2 = 1.0 / jnp.sqrt(float(hidden))
    w1 = jax.random.uniform(k1, (ndim + 1, hidden), jnp.float32, -s1, s1)
    b1 = jnp.zeros((hidden,), jnp.float32)
    w2 = jax.random.uniform(k2, (hidden, hidden), jnp.float32, -s2, s2)
    b2 = jnp.zeros((hidden,), jnp.float32)
    w3 = jax.random.uniform(k3, (hidden, ndim), jnp.float32, -s2, s2)
    b3 = jnp.zeros((ndim,), jnp.float32)
    return (w1, b1, w2, b2, w3, b3)


def reference_forward(x, t, params):
    """Pure-JAX reference matching the PyTorch InputWrapper.forward exactly."""
    w1, b1, w2, b2, w3, b3 = params
    B = x.shape[0]
    tcol = jnp.full((B, 1), t, dtype=x.dtype)
    tx = jnp.concatenate([tcol, x], axis=1)   # torch.cat((t.repeat(B)[:,None], x), 1)
    h = jnp.tanh(tx @ w1 + b1)
    h = jnp.tanh(h @ w2 + b2)
    return h @ w3 + b3


if __name__ == "__main__":
    NDIM, HIDDEN = 32, 64
    key = jax.random.PRNGKey(0)
    kx1, kx2, kp = jax.random.split(key, 3)
    params = init_params(kp, NDIM, HIDDEN)
    t = jnp.float32(0.37)

    # --- small batch (single 8-row tile), f32, tight tolerance --------------
    x_small = jax.random.normal(kx1, (8, NDIM), dtype=jnp.float32)
    out_s = jax.block_until_ready(input_wrapper_forward(x_small, t, params))
    ref_s = reference_forward(x_small, t, params)
    assert out_s.shape == (8, NDIM)
    assert jnp.allclose(out_s, ref_s, atol=1e-5, rtol=1e-5), "small f32 mismatch"

    # --- larger, non-multiple batch: exercises padding + 2-step batch grid --
    x_big = jax.random.normal(kx2, (300, NDIM), dtype=jnp.float32)
    out_b = jax.block_until_ready(
        input_wrapper_forward(x_big, t, params, block_rows=256))
    ref_b = reference_forward(x_big, t, params)
    assert out_b.shape == (300, NDIM)
    assert jnp.allclose(out_b, ref_b, atol=1e-5, rtol=1e-5), "gridded f32 mismatch"

    # --- bf16 matmul path (v6e/v7x MXU rate), f32 accumulation --------------
    out_bf = jax.block_until_ready(
        input_wrapper_forward(x_big, t, params, block_rows=256,
                              compute_dtype=jnp.bfloat16))
    assert out_bf.shape == (300, NDIM)
    assert jnp.allclose(out_bf, ref_b, atol=7e-2, rtol=7e-2), "bf16 mismatch"

    print("KERNEL_OK")
</pallas_src>

<mosaic_0001>
module attributes {stable_mosaic.version = 11 : i64} {
  func.func @_input_wrapper_mlp_kernel(%arg0: i32, %arg1: memref<1x1xf32, #tpu.memory_space<smem>>, %arg2: memref<8x32xf32, #tpu.memory_space<vmem>>, %arg3: memref<1x64xf32, #tpu.memory_space<vmem>>, %arg4: memref<32x64xf32, #tpu.memory_space<vmem>>, %arg5: memref<1x64xf32, #tpu.memory_space<vmem>>, %arg6: memref<64x64xf32, #tpu.memory_space<vmem>>, %arg7: memref<1x64xf32, #tpu.memory_space<vmem>>, %arg8: memref<64x32xf32, #tpu.memory_space<vmem>>, %arg9: memref<1x32xf32, #tpu.memory_space<vmem>>, %arg10: memref<8x32xf32, #tpu.memory_space<vmem>>) attributes {dimension_semantics = [#tpu.dimension_semantics<parallel>], iteration_bounds = array<i64: 1>, scalar_prefetch = 0 : i64, scratch_operands = 0 : i64, tpu.core_type = #tpu.core_type<tc>, window_params = [{transform_indices = @transform_0, window_bounds = array<i64: 1, 1>}, {transform_indices = @transform_1, window_bounds = array<i64: 8, 32>}, {pipeline_mode = #tpu.pipeline_mode<synchronous>, transform_indices = @transform_2, window_bounds = array<i64: 1, 64>}, {pipeline_mode = #tpu.pipeline_mode<synchronous>, transform_indices = @transform_3, window_bounds = array<i64: 32, 64>}, {pipeline_mode = #tpu.pipeline_mode<synchronous>, transform_indices = @transform_4, window_bounds = array<i64: 1, 64>}, {pipeline_mode = #tpu.pipeline_mode<synchronous>, transform_indices = @transform_5, window_bounds = array<i64: 64, 64>}, {pipeline_mode = #tpu.pipeline_mode<synchronous>, transform_indices = @transform_6, window_bounds = array<i64: 1, 64>}, {pipeline_mode = #tpu.pipeline_mode<synchronous>, transform_indices = @transform_7, window_bounds = array<i64: 64, 32>}, {pipeline_mode = #tpu.pipeline_mode<synchronous>, transform_indices = @transform_8, window_bounds = array<i64: 1, 32>}, {transform_indices = @transform_9, window_bounds = array<i64: 8, 32>}]} {
    %c0 = arith.constant 0 : index
    %c0_0 = arith.constant 0 : index
    %0 = memref.load %arg1[%c0, %c0_0] : memref<1x1xf32, #tpu.memory_space<smem>>
    %c0_1 = arith.constant 0 : index
    %c0_2 = arith.constant 0 : index
    %1 = vector.load %arg2[%c0_1, %c0_2] : memref<8x32xf32, #tpu.memory_space<vmem>>, vector<8x32xf32>
    %c0_3 = arith.constant 0 : index
    %c0_4 = arith.constant 0 : index
    %2 = vector.load %arg3[%c0_3, %c0_4] : memref<1x64xf32, #tpu.memory_space<vmem>>, vector<1x64xf32>
    %3 = vector.broadcast %0 : f32 to vector<1x64xf32>
    %4 = arith.mulf %3, %2 : vector<1x64xf32>
    %c0_5 = arith.constant 0 : index
    %c0_6 = arith.constant 0 : index
    %5 = vector.load %arg5[%c0_5, %c0_6] : memref<1x64xf32, #tpu.memory_space<vmem>>, vector<1x64xf32>
    %6 = arith.addf %4, %5 : vector<1x64xf32>
    %c0_7 = arith.constant 0 : index
    %c0_8 = arith.constant 0 : index
    %7 = vector.load %arg4[%c0_7, %c0_8] : memref<32x64xf32, #tpu.memory_space<vmem>>, vector<32x64xf32>
    %cst = arith.constant dense<0.000000e+00> : vector<8x64xf32>
    %8 = tpu.matmul %1, %7, %cst {dimension_numbers = #tpu.dot_dimension_numbers<[1], [0], [0], [1], [0, 0, 1, 1], [], []>} : vector<8x32xf32>, vector<32x64xf32>, vector<8x64xf32> -> vector<8x64xf32>
    %9 = vector.broadcast %6 : vector<1x64xf32> to vector<8x64xf32>
    %10 = arith.addf %8, %9 : vector<8x64xf32>
    %11 = math.tanh %10 : vector<8x64xf32>
    %c0_9 = arith.constant 0 : index
    %c0_10 = arith.constant 0 : index
    %12 = vector.load %arg6[%c0_9, %c0_10] : memref<64x64xf32, #tpu.memory_space<vmem>>, vector<64x64xf32>
    %cst_11 = arith.constant dense<0.000000e+00> : vector<8x64xf32>
    %13 = tpu.matmul %11, %12, %cst_11 {dimension_numbers = #tpu.dot_dimension_numbers<[1], [0], [0], [1], [0, 0, 1, 1], [], []>} : vector<8x64xf32>, vector<64x64xf32>, vector<8x64xf32> -> vector<8x64xf32>
    %c0_12 = arith.constant 0 : index
    %c0_13 = arith.constant 0 : index
    %14 = vector.load %arg7[%c0_12, %c0_13] : memref<1x64xf32, #tpu.memory_space<vmem>>, vector<1x64xf32>
    %15 = vector.broadcast %14 : vector<1x64xf32> to vector<8x64xf32>
    %16 = arith.addf %13, %15 : vector<8x64xf32>
    %17 = math.tanh %16 : vector<8x64xf32>
    %c0_14 = arith.constant 0 : index
    %c0_15 = arith.constant 0 : index
    %18 = vector.load %arg8[%c0_14, %c0_15] : memref<64x32xf32, #tpu.memory_space<vmem>>, vector<64x32xf32>
    %cst_16 = arith.constant dense<0.000000e+00> : vector<8x32xf32>
    %19 = tpu.matmul %17, %18, %cst_16 {dimension_numbers = #tpu.dot_dimension_numbers<[1], [0], [0], [1], [0, 0, 1, 1], [], []>} : vector<8x64xf32>, vector<64x32xf32>, vector<8x32xf32> -> vector<8x32xf32>
    %c0_17 = arith.constant 0 : index
    %c0_18 = arith.constant 0 : index
    %20 = vector.load %arg9[%c0_17, %c0_18] : memref<1x32xf32, #tpu.memory_space<vmem>>, vector<1x32xf32>
    %21 = vector.broadcast %20 : vector<1x32xf32> to vector<8x32xf32>
    %22 = arith.addf %19, %21 : vector<8x32xf32>
    %c0_19 = arith.constant 0 : index
    %c0_20 = arith.constant 0 : index
    %23 = vector.load %arg10[%c0_19, %c0_20] : memref<8x32xf32, #tpu.memory_space<vmem>>, vector<8x32xf32>
    tpu.vector_store %arg10[%c0_19, %c0_20], %22 {strides = array<i32>} : memref<8x32xf32, #tpu.memory_space<vmem>>, vector<8x32xf32>,
    return
  }
  func.func @transform_0(%arg0: i32) -> (i32, i32) {
    %c0_i32 = arith.constant 0 : i32
    %c0_i32_0 = arith.constant 0 : i32
    %c0_i32_1 = arith.constant 0 : i32
    return %c0_i32, %c0_i32_0 : i32, i32
  }
  func.func @transform_1(%arg0: i32) -> (i32, i32) {
    %c0_i32 = arith.constant 0 : i32
    %c0_i32_0 = arith.constant 0 : i32
    return %arg0, %c0_i32 : i32, i32
  }
  func.func @transform_2(%arg0: i32) -> (i32, i32) {
    %c0_i32 = arith.constant 0 : i32
    %c0_i32_0 = arith.constant 0 : i32
    %c0_i32_1 = arith.constant 0 : i32
    return %c0_i32, %c0_i32_0 : i32, i32
  }
  func.func @transform_3(%arg0: i32) -> (i32, i32) {
    %c0_i32 = arith.constant 0 : i32
    %c0_i32_0 = arith.constant 0 : i32
    %c0_i32_1 = arith.constant 0 : i32
    return %c0_i32, %c0_i32_0 : i32, i32
  }
  func.func @transform_4(%arg0: i32) -> (i32, i32) {
    %c0_i32 = arith.constant 0 : i32
    %c0_i32_0 = arith.constant 0 : i32
    %c0_i32_1 = arith.constant 0 : i32
    return %c0_i32, %c0_i32_0 : i32, i32
  }
  func.func @transform_5(%arg0: i32) -> (i32, i32) {
    %c0_i32 = arith.constant 0 : i32
    %c0_i32_0 = arith.constant 0 : i32
    %c0_i32_1 = arith.constant 0 : i32
    return %c0_i32, %c0_i32_0 : i32, i32
  }
  func.func @transform_6(%arg0: i32) -> (i32, i32) {
    %c0_i32 = arith.constant 0 : i32
    %c0_i32_0 = arith.constant 0 : i32
    %c0_i32_1 = arith.constant 0 : i32
    return %c0_i32, %c0_i32_0 : i32, i32
  }
  func.func @transform_7(%arg0: i32) -> (i32, i32) {
    %c0_i32 = arith.constant 0 : i32
    %c0_i32_0 = arith.constant 0 : i32
    %c0_i32_1 = arith.constant 0 : i32
    return %c0_i32, %c0_i32_0 : i32, i32
  }
  func.func @transform_8(%arg0: i32) -> (i32, i32) {
    %c0_i32 = arith.constant 0 : i32
    %c0_i32_0 = arith.constant 0 : i32
    %c0_i32_1 = arith.constant 0 : i32
    return %c0_i32, %c0_i32_0 : i32, i32
  }
  func.func @transform_9(%arg0: i32) -> (i32, i32) {
    %c0_i32 = arith.constant 0 : i32
    %c0_i32_0 = arith.constant 0 : i32
    return %arg0, %c0_i32 : i32, i32
  }
}

</mosaic_0001>

<bundles_post_ra>
// kernel: tpu_custom_call.1
= control target key start
LH: loop header
LB: loop body
LE: loop exit
PB: predicated region body
PF: predicated region fallthrough
CT: control target
= control target key end

     0   :  { %v458_v3 = vmov 0.0|0.0   ;;  %vm459_vm0 = vmmov 0   ;;  %v460_v6 = vmov 0.0   ;;  %s619_s0 = inlined_call_operand.<no memory space> [shape: f32[1,1], index: 0, kind: input, shape index: {}]   ;;  %s620_s1 = inlined_call_operand.vmem [shape: f32[8,32], index: 1, kind: input, shape index: {}]   ;;  %s621_s2 = inlined_call_operand.vmem [shape: f32[1,64], index: 2, kind: input, shape index: {}]   ;;  %s622_s3 = inlined_call_operand.vmem [shape: f32[32,64], index: 3, kind: input, shape index: {}]   ;;  %s623_s4 = inlined_call_operand.vmem [shape: f32[1,64], index: 4, kind: input, shape index: {}]   ;;  %s624_s5 = inlined_call_operand.vmem [shape: f32[64,64], index: 5, kind: input, shape index: {}]   ;;  %s625_s6 = inlined_call_operand.vmem [shape: f32[1,64], index: 6, kind: input, shape index: {}]   ;;  %s626_s7 = inlined_call_operand.vmem [shape: f32[64,32], index: 7, kind: input, shape index: {}]   ;;  %s627_s8 = inlined_call_operand.vmem [shape: f32[1,32], index: 8, kind: input, shape index: {}]   ;;  %s628_s9 = inlined_call_operand.hbm [shape: f32[8,32], index: 9, kind: output, shape index: {}]  }
   0x1   :  { %v41_v0 = vld [vmem:[%s622_s3] sm:$0xff]  ;;  %v42_v1 = vld [vmem:[%s622_s3 + $0x8] sm:$0xff]  ;;  %v43_v2 = vld [vmem:[%s622_s3 + $0x10] sm:$0xff]  ;;  %396 = vmatprep.subr.bf16.mxu0 %v458_v3  ;;  %355 = vmatprep.mubr.msk.f32.mxu0 %vm459_vm0, %v460_v6 }
   0x2   :  { %v397_v4 = vpack.c.bf16 %v42_v1, %v41_v0  ;;  %v44_v5 = vld [vmem:[%s622_s3 + $0x18] sm:$0xff]  ;;  %v126_v7 = vld [vmem:[%s624_s5] sm:$0xff]  ;;  %402 = vmatprep.subr.bf16.mxu1 %v458_v3  ;;  %v127_v8 = vld [vmem:[%s624_s5 + $0x8] sm:$0xff]  ;;  %374 = vmatprep.mubr.msk.f32.mxu1 %vm459_vm0, %v460_v6 }
   0x3   :  { %v400_v9 = vpack.c.bf16 %v44_v5, %v43_v2  ;;  %v403_v10 = vpack.c.bf16 %v127_v8, %v126_v7 }
   0x4   :  { %398 = vmatpush3.bf16.msra.mxu0 %v397_v4 }
   0x5   :  { %15 = vsyncpa [#allocation4], 0  ;;  %399 = vmatprep.subr.bf16.mxu0 %v458_v3  ;;  %404 = vmatpush3.bf16.msra.mxu1 %v403_v10  ;;  %v35_v11 = vld [vmem:[%s620_s1] sm:$0xff]  ;;  %vm51_vm1 = vcmask 261120   ;;  %v128_v12 = vld [vmem:[%s624_s5 + $0x10] sm:$0xff]  ;;  %v46_v24 = vlaneseq  ;;  %v37_v26 = vstv %s619_s0  ;;  %vm141_vm2 = vcmask 523264  }
   0x6   :  { %405 = vmatprep.subr.bf16.mxu1 %v458_v3  ;;  %v129_v13 = vld [vmem:[%s624_s5 + $0x18] sm:$0xff]  ;;  %v130_v15 = vld [vmem:[%s624_s5 + $0x20] sm:$0xff]  ;;  %v131_v16 = vld [vmem:[%s624_s5 + $0x28] sm:$0xff] }
   0x7   :  { %v406_v14 = vpack.c.bf16 %v129_v13, %v128_v12  ;;  %v409_v17 = vpack.c.bf16 %v131_v16, %v130_v15  ;;  %v132_v18 = vld [vmem:[%s624_s5 + $0x30] sm:$0xff]  ;;  %v133_v19 = vld [vmem:[%s624_s5 + $0x38] sm:$0xff]  ;;  %v216_v21 = vld [vmem:[%s626_s7] sm:$0xff]  ;;  %v47_v28 = vshrl.u32 %v46_v24, 7 }
   0x8   :  { %401 = vmatpush3.bf16.msra.mxu0 %v400_v9  ;;  %v412_v20 = vpack.c.bf16 %v133_v19, %v132_v18  ;;  %v217_v22 = vld [vmem:[%s626_s7 + $0x8] sm:$0xff]  ;;  %v36_v25 = vld [vmem:[%s621_s2] sm:$0x1]  ;;  %v218_v37 = vld [vmem:[%s626_s7 + $0x10] sm:$0xff] }
   0x9   :  { %414 = vmatprep.subr.bf16.mxu0 %v458_v3  ;;  %407 = vmatpush3.bf16.msra.mxu1 %v406_v14  ;;  %v415_v23 = vpack.c.bf16 %v217_v22, %v216_v21  ;;  %v38_v27 = vmul.f32 %v37_v26, %v36_v25  ;;  %v39_v29 = vld [vmem:[%s623_s4] sm:$0x1]  ;;  %v48_v31 = vsub.s32 0, %v47_v28  ;;  %v219_v38 = vld [vmem:[%s626_s7 + $0x18] sm:$0xff]  ;;  %v221_v41 = vld [vmem:[%s626_s7 + $0x28] sm:$0xff] }
   0xa   :  { %408 = vmatprep.subr.bf16.mxu1 %v458_v3  ;;  %v418_v39 = vpack.c.bf16 %v219_v38, %v218_v37  ;;  %v220_v40 = vld [vmem:[%s626_s7 + $0x20] sm:$0xff]  ;;  %v222_v43 = vld [vmem:[%s626_s7 + $0x30] sm:$0xff]  ;;  %v223_v44 = vld [vmem:[%s626_s7 + $0x38] sm:$0xff]  ;;  %s461_s7 = smov [#allocation3]  }
   0xb   :  { %356 = vmatmul.mubr.msk.f32.vlgmr.msra.gmra.mrb[0].mxu0 %vm51_vm1, %v35_v11  ;;  %v40_v30 = vadd.f32 %v39_v29, %v38_v27  ;;  %v421_v42 = vpack.c.bf16 %v221_v41, %v220_v40  ;;  %v424_v45 = vpack.c.bf16 %v223_v44, %v222_v43  ;;  %v320_v46 = vld [vmem:[%s625_s6] ss:$0 sm:$0xff]  ;;  %s311_s11 = sshll.u32 %s461_s7, 4  ;;  %s312_s11 = int_to_ptr.vmem [resolvable:$true] %s311_s11 }
   0xc   :  { %393 = vmatprep.mubr.msk.f32.mxu0 %vm459_vm0, %v460_v6  ;;  %416 = vmatpush3.bf16.msra.mxu0 %v415_v23  ;;  %v322_v51 = vld [vmem:[%s627_s8] ss:$0 sm:$0xff]  ;;  %s434_s6 = scalar_lea.vmem %s312_s11, 128  ;;  %p439_p1 = scmp.lt.s32.totalorder %s312_s11, %s312_s11 }
   0xd   :  { %410 = vmatpush3.bf16.msra.mxu1 %v409_v17  ;;  %417 = vmatprep.subr.bf16.mxu0 %v458_v3  ;;  %v49_v32 = vrot.slane %v40_v30, %v48_v31  ;;  %p435_p0 = scmp.ne.s32.totalorder %s312_s11, %s434_s6  ;;  %p440_p2 = scmp.lt.s32.totalorder %s434_s6, %s434_s6 }
   0xe   :  { %411 = vmatprep.subr.bf16.mxu1 %v458_v3 }
   0xf   :  { %p441_p3 = por %p440_p2, %p439_p1 }
  0x10   :  { %419 = vmatpush3.bf16.msra.mxu0 %v418_v39 }
  0x11   :  { %413 = vmatpush3.bf16.msra.mxu1 %v412_v20  ;;  %420 = vmatprep.subr.bf16.mxu0 %v458_v3  ;;  %p442_p4 = pnand %p441_p3, %p435_p0 }
  0x14   :  { %422 = vmatpush3.bf16.msra.mxu0 %v421_v42 }
  0x15   :  { %423 = vmatprep.subr.bf16.mxu0 %v458_v3 }
  0x18   :  { %425 = vmatpush3.bf16.msra.mxu0 %v424_v45 }
  0xde   :  { %v121_v33 = vpop.f32.mrb[0].mxu0 }
  0xdf   :  { %v122_v34 = vadd.f32 %v121_v33, %v49_v32  ;;  %v357_v35 = vpop.f32.mrb[1].mxu0 }
  0xe1   :  { %430 = vtanh.f32 %v122_v34 }
  0xeb   :  { %v431_v36 = vpop.eup %430 }
  0xec   :  { %375 = vmatmul.mubr.msk.f32.vlgmr.msra.gmra.mrb[0].mxu1 %vm141_vm2, %v431_v36 }
 0x1bf   :  { %v211_v47 = vpop.f32.mrb[0].mxu1 }
 0x1c0   :  { %v212_v48 = vadd.f32 %v320_v46, %v211_v47  ;;  %v376_v49 = vpop.f32.mrb[1].mxu1 }
 0x1c2   :  { %432 = vtanh.f32 %v212_v48 }
 0x1cc   :  { %v433_v50 = vpop.eup %432 }
 0x1cd   :  { %394 = vmatmul.mubr.msk.f32.vlgmr.msra.gmra.mrb[2].mxu0 %vm141_vm2, %v433_v50 }
 0x2a0   :  { %v300_v52 = vpop.f32.mrb[2].mxu0 }
 0x2a1   :  { %v301_v53 = vadd.f32 %v322_v51, %v300_v52  ;;  %v395_v54 = vpop.f32.mrb[3].mxu0 }
 0x2a3   :  { %304 = vst.msk [vmem:[#allocation3] sm:$0xff] %vm51_vm1, %v301_v53 }
 0x2a4   :  { %445 = shalt.err (!%p442_p4)
}
 0x2a5   :  { %s446_s14 = scalar_lea.hbm %s628_s9, 128 }
 0x2a6   :  { %p447_p5 = scmp.ne.s32.totalorder %s628_s9, %s446_s14  ;;  %p450_p6 = scmp.lt.u32.totalorder %s446_s14, %s628_s9 }
 0x2a8   :  { %p452_p7 = pnand %p450_p6, %p447_p5 }
 0x2aa   :  { %455 = shalt.err (!%p452_p7)
}
 0x2ab   :  { %314 = dma.vmem_to_hbm [thread:$0]  %s312_s11, 128, %s628_s9, [#allocation4]  }
 0x2ac   :  { %456 = dma.done.wait [#allocation4], 128  }
 0x2ad   :  { %457 = vsyncadd [#allocation4], 4294967168 }
 0x2ae   :  { %318 = vsyncpa [#allocation4], 1 }

</bundles_post_ra>
